<compile_context>
chip_gen: v7x
topology: tpu7x:2x2x1
jax: 0.10.0
libtpu: 0.0.40
codegen_flags: <defaults>
</compile_context>

<pallas_src>
import functools

import jax
import jax.numpy as jnp
import numpy as np
from jax.experimental import pallas as pl
from jax.experimental.pallas import tpu as pltpu

PROMPT_LEVELS = (1, 2)   # -> num_prompts = 1 + 4 = 5
LN_EPS = 1e-5


@functools.lru_cache(maxsize=None)
def _adaptive_pool_matrix(H, W, prompt_levels):
    """(num_prompts, H*W) averaging matrix matching nn.AdaptiveAvgPool2d
    exactly (PyTorch floor/ceil bin edges, so non-divisible H/W also work)."""
    rows = []
    for lvl in prompt_levels:
        for i in range(lvl):
            h0 = (i * H) // lvl
            h1 = -((-(i + 1) * H) // lvl)          # ceil((i+1)*H/lvl)
            for j in range(lvl):
                w0 = (j * W) // lvl
                w1 = -((-(j + 1) * W) // lvl)
                r = np.zeros((H, W), np.float32)
                r[h0:h1, w0:w1] = 1.0 / float((h1 - h0) * (w1 - w0))
                rows.append(r.reshape(-1))
    return np.stack(rows, axis=0)                  # (num_prompts, H*W)


def _pick_spatial_tile(S, row_bytes, budget_bytes):
    """Largest 128-multiple spatial tile dividing S whose x block fits the
    per-buffer budget; falls back to the full S when S is not 128-aligned."""
    if S % 128 != 0:
        return S
    candidates = [t for t in range(128, S + 1, 128) if S % t == 0]
    fitting = [t for t in candidates if t * row_bytes <= budget_bytes]
    return max(fitting) if fitting else min(candidates)


def _cond_prompt_kernel(x_ref, pool_ref, w_in_ref, b_in_ref, mask_ref,
                        w_out_ref, lang_ref, gamma_ref, beta_ref,
                        out_ref, acc_ref):
    k = pl.program_id(1)

    @pl.when(k == 0)
    def _init():
        acc_ref[...] = jnp.zeros_like(acc_ref)

    # Partial adaptive-avg-pool for this spatial tile:
    #   (p, tS) x (TB*C, tS) contracted on the last dims -> (p, TB*C),
    # compute-dtype MXU operands, f32 accumulation in VMEM scratch.
    xb = x_ref[...].astype(pool_ref.dtype)
    acc_ref[...] += jax.lax.dot_general(
        pool_ref[...], xb,
        dimension_numbers=(((1,), (1,)), ((), ())),
        preferred_element_type=jnp.float32)

    @pl.when(k == pl.num_programs(1) - 1)
    def _finalize():
        C = w_in_ref.shape[0]
        p = lang_ref.shape[0]
        TB = acc_ref.shape[1] // C
        cdt = w_in_ref.dtype

        # (p, TB*C) -> (TB*p, C): per-batch static lane slices (no transposes).
        acc = acc_ref[...]
        if TB == 1:
            pooled = acc
        else:
            pooled = jnp.concatenate(
                [acc[:, b * C:(b + 1) * C] for b in range(TB)], axis=0)

        # in_linear (all levels at once) + ReLU + level-selection mask.
        h = jnp.dot(pooled.astype(cdt), w_in_ref[...],
                    preferred_element_type=jnp.float32) + b_in_ref[...]
        h = jnp.maximum(h, 0.0)

        mask = mask_ref[...]
        lang = lang_ref[...]
        if TB > 1:   # replicate the tiny per-prompt tables in VMEM, not HBM
            mask = jnp.concatenate([mask] * TB, axis=0)
            lang = jnp.concatenate([lang] * TB, axis=0)
        h = h * mask

        # out_linear: stacked (L*T, T) weight; the mask makes it per-level exact.
        y = jnp.dot(h.astype(cdt), w_out_ref[...],
                    preferred_element_type=jnp.float32)

        # + lang embedding (out-linear bias folded in), then LayerNorm in f32.
        cp = y + lang
        mu = jnp.mean(cp, axis=-1, keepdims=True)
        var = jnp.mean(jnp.square(cp - mu), axis=-1, keepdims=True)
        normed = (cp - mu) * jax.lax.rsqrt(var + LN_EPS)

        out_ref[...] = (normed * gamma_ref[...] + beta_ref[...]).astype(out_ref.dtype)


def conditional_prompt_forward(vis_nchw, l_mask, params,
                               prompt_levels=PROMPT_LEVELS,
                               batch_tiles=1,
                               compute_dtype=jnp.bfloat16,
                               x_block_bytes=4 << 20,
                               vmem_limit_bytes=None):
    """batch_tiles=1 on v5e/v6e (single TensorCore); batch_tiles=2 on v7x so
    both TensorCores get a batch half (requires the asserts below)."""
    B, C, H, W = vis_nchw.shape
    T = params["lang_prompts"].shape[1]
    L = len(prompt_levels)
    p = sum(l * l for l in prompt_levels)
    S = H * W
    assert B % batch_tiles == 0
    TB = B // batch_tiles
    x_dtype = vis_nchw.dtype
    out_dtype = x_dtype
    if batch_tiles > 1:
        sub_in = 8 if jnp.dtype(x_dtype).itemsize == 4 else 16
        sub_out = 8 if jnp.dtype(out_dtype).itemsize == 4 else 16
        assert (TB * C) % sub_in == 0, "batch-tiled vis block violates (8,128) rule"
        assert (TB * p) % sub_out == 0, "batch-tiled output block violates (8,128) rule"

    # Zero-copy (B*C, S) view of NCHW — no NHWC transpose / extra HBM pass.
    x2d = vis_nchw.reshape(B * C, S)

    # Shared (p, S) adaptive-pool matrix (no block-diagonal kron), cached on host.
    pool_mat = jnp.asarray(_adaptive_pool_matrix(H, W, tuple(prompt_levels)),
                           dtype=compute_dtype)

    tS = _pick_spatial_tile(S, TB * C * jnp.dtype(x_dtype).itemsize, x_block_bytes)
    n_s = S // tS

    # Concatenated / stacked per-level weights; matmul operands in compute dtype.
    w_in_cat = jnp.concatenate([params["w_in"][i] for i in range(L)],
                               axis=1).astype(compute_dtype)              # (C, L*T)
    b_in_cat = jnp.concatenate([params["b_in"][i] for i in range(L)],
                               axis=0).reshape(1, L * T).astype(jnp.float32)
    w_out_stack = jnp.concatenate([params["w_out"][i] for i in range(L)],
                                  axis=0).astype(compute_dtype)           # (L*T, T)

    # Per-prompt level-selection mask (p, L*T) — replicated in-kernel, not in HBM.
    level_of_prompt = np.concatenate(
        [np.full(l * l, i, np.int32) for i, l in enumerate(prompt_levels)])
    mask_np = np.zeros((p, L * T), np.float32)
    for r, lv in enumerate(level_of_prompt):
        mask_np[r, lv * T:(lv + 1) * T] = 1.0
    mask_p = jnp.asarray(mask_np)

    # Fold the out-linear bias into the lang-prompt embedding (f32, tiny).
    b_out_rows = jnp.stack([params["b_out"][int(lv)] for lv in level_of_prompt],
                           axis=0)                                        # (p, T)
    lang_bias = (params["lang_prompts"] + b_out_rows).astype(jnp.float32)

    gamma = params["ln_gamma"].reshape(1, T).astype(jnp.float32)
    beta = params["ln_beta"].reshape(1, T).astype(jnp.float32)

    cdt_size = jnp.dtype(compute_dtype).itemsize
    cost = pl.CostEstimate(
        flops=int(2 * B * p * (S * C + C * L * T + L * T * T)),
        transcendentals=int(B * p),
        bytes_accessed=int(B * C * S * jnp.dtype(x_dtype).itemsize
                           + B * p * T * jnp.dtype(out_dtype).itemsize
                           + (p * S + C * L * T + L * T * T) * cdt_size))

    cp_kwargs = dict(dimension_semantics=("parallel", "arbitrary"))
    if vmem_limit_bytes is not None:
        cp_kwargs["vmem_limit_bytes"] = int(vmem_limit_bytes)

    out2d = pl.pallas_call(
        _cond_prompt_kernel,
        out_shape=jax.ShapeDtypeStruct((B * p, T), out_dtype),
        grid=(batch_tiles, n_s),
        in_specs=[
            pl.BlockSpec((TB * C, tS), lambda t, k: (t, k)),   # vis (B*C, S) view
            pl.BlockSpec((p, tS), lambda t, k: (0, k)),        # shared pool matrix
            pl.BlockSpec((C, L * T), lambda t, k: (0, 0)),     # concat in_linear W
            pl.BlockSpec((1, L * T), lambda t, k: (0, 0)),     # concat in_linear b
            pl.BlockSpec((p, L * T), lambda t, k: (0, 0)),     # level mask
            pl.BlockSpec((L * T, T), lambda t, k: (0, 0)),     # stacked out_linear W
            pl.BlockSpec((p, T), lambda t, k: (0, 0)),         # lang + out bias
            pl.BlockSpec((1, T), lambda t, k: (0, 0)),         # LN gamma
            pl.BlockSpec((1, T), lambda t, k: (0, 0)),         # LN beta
        ],
        out_specs=pl.BlockSpec((TB * p, T), lambda t, k: (t, 0)),
        scratch_shapes=[pltpu.VMEM((p, TB * C), jnp.float32)],
        compiler_params=pltpu.CompilerParams(**cp_kwargs),
        cost_estimate=cost,
    )(x2d, pool_mat, w_in_cat, b_in_cat, mask_p, w_out_stack,
      lang_bias, gamma, beta)

    cond_prompts = out2d.reshape(B, p, T)

    # l_mask extension (glue): concat ones for the prompt tokens.
    ones = jnp.ones((B, p), dtype=l_mask.dtype)
    l_mask_out = jnp.concatenate([l_mask, ones], axis=1)
    return cond_prompts, l_mask_out


def reference_forward(vis_nchw, l_mask, params, prompt_levels=PROMPT_LEVELS):
    """Pure-JAX reference mirroring the PyTorch forward (divisible H/W case)."""
    B, C, H, W = vis_nchw.shape
    outs = []
    for i, lvl in enumerate(prompt_levels):
        x = vis_nchw.reshape(B, C, lvl, H // lvl, lvl, W // lvl).mean(axis=(3, 5))
        x = x.reshape(B, C, lvl * lvl).transpose(0, 2, 1)            # (B, p_i, C)
        h = jnp.maximum(x @ params["w_in"][i] + params["b_in"][i], 0.0)
        outs.append(h @ params["w_out"][i] + params["b_out"][i])
    vis_prompts = jnp.concatenate(outs, axis=1)
    cp = params["lang_prompts"][None] + vis_prompts
    mu = cp.mean(-1, keepdims=True)
    var = jnp.square(cp - mu).mean(-1, keepdims=True)
    cp = (cp - mu) / jnp.sqrt(var + LN_EPS) * params["ln_gamma"] + params["ln_beta"]
    num_prompts = sum(l * l for l in prompt_levels)
    mask = jnp.concatenate(
        [l_mask, jnp.ones((B, num_prompts), l_mask.dtype)], axis=1)
    return cp, mask


def init_params(key, vis_dim, text_dim, prompt_levels=PROMPT_LEVELS):
    num_prompts = sum(l * l for l in prompt_levels)
    keys = jax.random.split(key, 2 * len(prompt_levels) + 1)
    params = {"w_in": [], "b_in": [], "w_out": [], "b_out": []}
    for i in range(len(prompt_levels)):
        # trunc_normal_(std=0.02) analogue; biases = 0 (per init_weights()).
        params["w_in"].append(0.02 * jax.random.truncated_normal(
            keys[2 * i], -2.0, 2.0, (vis_dim, text_dim), jnp.float32))
        params["b_in"].append(jnp.zeros((text_dim,), jnp.float32))
        params["w_out"].append(0.02 * jax.random.truncated_normal(
            keys[2 * i + 1], -2.0, 2.0, (text_dim, text_dim), jnp.float32))
        params["b_out"].append(jnp.zeros((text_dim,), jnp.float32))
    # nn.Embedding default init: N(0, 1)
    params["lang_prompts"] = jax.random.normal(
        keys[-1], (num_prompts, text_dim), jnp.float32)
    params["ln_gamma"] = jnp.ones((text_dim,), jnp.float32)
    params["ln_beta"] = jnp.zeros((text_dim,), jnp.float32)
    return params


if __name__ == "__main__":
    B, C, H, W, T, L_text = 2, 32, 16, 16, 32, 8
    key = jax.random.PRNGKey(0)
    k_vis, k_mask, k_par = jax.random.split(key, 3)

    vis = jax.random.normal(k_vis, (B, C, H, W), jnp.float32)       # NCHW, like PyTorch
    l_mask = (jax.random.uniform(k_mask, (B, L_text)) > 0.3).astype(jnp.float32)
    params = init_params(k_par, C, T)

    ref_out, ref_mask = reference_forward(vis, l_mask, params)

    # f32 compute path; tiny x-block budget forces tS=128 -> 2 spatial grid
    # steps, exercising the init/accumulate/finalize pipeline.
    out32, mask32 = conditional_prompt_forward(
        vis, l_mask, params, compute_dtype=jnp.float32, x_block_bytes=32 * 1024)
    out32 = jax.block_until_ready(out32)
    mask32 = jax.block_until_ready(mask32)
    np.testing.assert_allclose(np.asarray(out32), np.asarray(ref_out),
                               atol=2e-4, rtol=2e-4)
    np.testing.assert_allclose(np.asarray(mask32), np.asarray(ref_mask))

    # bf16 matmul-operand path (recommended production config), looser tolerance.
    out16, mask16 = conditional_prompt_forward(
        vis, l_mask, params, compute_dtype=jnp.bfloat16)
    out16 = jax.block_until_ready(out16)
    mask16 = jax.block_until_ready(mask16)
    np.testing.assert_allclose(np.asarray(out16), np.asarray(ref_out),
                               atol=1e-2, rtol=1e-2)
    np.testing.assert_allclose(np.asarray(mask16), np.asarray(ref_mask))

    print("KERNEL_OK")
</pallas_src>

<mosaic_0001>
module attributes {stable_mosaic.version = 11 : i64} {
  func.func @_cond_prompt_kernel(%arg0: i32, %arg1: i32, %arg2: memref<64x128xf32, #tpu.memory_space<vmem>>, %arg3: memref<5x128xf32, #tpu.memory_space<vmem>>, %arg4: memref<32x64xf32, #tpu.memory_space<vmem>>, %arg5: memref<1x64xf32, #tpu.memory_space<vmem>>, %arg6: memref<5x64xf32, #tpu.memory_space<vmem>>, %arg7: memref<64x32xf32, #tpu.memory_space<vmem>>, %arg8: memref<5x32xf32, #tpu.memory_space<vmem>>, %arg9: memref<1x32xf32, #tpu.memory_space<vmem>>, %arg10: memref<1x32xf32, #tpu.memory_space<vmem>>, %arg11: memref<10x32xf32, #tpu.memory_space<vmem>>, %arg12: memref<5x64xf32, #tpu.memory_space<vmem>>) attributes {dimension_semantics = [#tpu.dimension_semantics<parallel>, #tpu.dimension_semantics<arbitrary>], iteration_bounds = array<i64: 1, 2>, scalar_prefetch = 0 : i64, scratch_operands = 1 : i64, tpu.core_type = #tpu.core_type<tc>, window_params = [{transform_indices = @transform_0, window_bounds = array<i64: 64, 128>}, {transform_indices = @transform_1, window_bounds = array<i64: 5, 128>}, {pipeline_mode = #tpu.pipeline_mode<synchronous>, transform_indices = @transform_2, window_bounds = array<i64: 32, 64>}, {pipeline_mode = #tpu.pipeline_mode<synchronous>, transform_indices = @transform_3, window_bounds = array<i64: 1, 64>}, {pipeline_mode = #tpu.pipeline_mode<synchronous>, transform_indices = @transform_4, window_bounds = array<i64: 5, 64>}, {pipeline_mode = #tpu.pipeline_mode<synchronous>, transform_indices = @transform_5, window_bounds = array<i64: 64, 32>}, {pipeline_mode = #tpu.pipeline_mode<synchronous>, transform_indices = @transform_6, window_bounds = array<i64: 5, 32>}, {pipeline_mode = #tpu.pipeline_mode<synchronous>, transform_indices = @transform_7, window_bounds = array<i64: 1, 32>}, {pipeline_mode = #tpu.pipeline_mode<synchronous>, transform_indices = @transform_8, window_bounds = array<i64: 1, 32>}, {transform_indices = @transform_9, window_bounds = array<i64: 10, 32>}]} {
    %c0_i32 = arith.constant 0 : i32
    %0 = arith.cmpi eq, %arg1, %c0_i32 : i32
    %1 = arith.extui %0 : i1 to i32
    %c0_i32_0 = arith.constant 0 : i32
    %2 = arith.cmpi ne, %1, %c0_i32_0 : i32
    scf.if %2 {
      %cst_9 = arith.constant 0.000000e+00 : f32
      %12 = vector.broadcast %cst_9 : f32 to vector<5x64xf32>
      %c0_10 = arith.constant 0 : index
      %c0_11 = arith.constant 0 : index
      %13 = vector.load %arg12[%c0_10, %c0_11] : memref<5x64xf32, #tpu.memory_space<vmem>>, vector<5x64xf32>
      tpu.vector_store %arg12[%c0_10, %c0_11], %12 {strides = array<i32>} : memref<5x64xf32, #tpu.memory_space<vmem>>, vector<5x64xf32>,
    } else {
    }
    %c0 = arith.constant 0 : index
    %c0_1 = arith.constant 0 : index
    %3 = vector.load %arg2[%c0, %c0_1] : memref<64x128xf32, #tpu.memory_space<vmem>>, vector<64x128xf32>
    %c0_2 = arith.constant 0 : index
    %c0_3 = arith.constant 0 : index
    %4 = vector.load %arg12[%c0_2, %c0_3] : memref<5x64xf32, #tpu.memory_space<vmem>>, vector<5x64xf32>
    %c0_4 = arith.constant 0 : index
    %c0_5 = arith.constant 0 : index
    %5 = vector.load %arg3[%c0_4, %c0_5] : memref<5x128xf32, #tpu.memory_space<vmem>>, vector<5x128xf32>
    %cst = arith.constant dense<0.000000e+00> : vector<5x64xf32>
    %6 = tpu.matmul %5, %3, %cst {dimension_numbers = #tpu.dot_dimension_numbers<[1], [1], [0], [0], [0, 0, 1, 0], [], []>} : vector<5x128xf32>, vector<64x128xf32>, vector<5x64xf32> -> vector<5x64xf32>
    %7 = arith.addf %4, %6 : vector<5x64xf32>
    %c0_6 = arith.constant 0 : index
    %c0_7 = arith.constant 0 : index
    %8 = vector.load %arg12[%c0_6, %c0_7] : memref<5x64xf32, #tpu.memory_space<vmem>>, vector<5x64xf32>
    tpu.vector_store %arg12[%c0_6, %c0_7], %7 {strides = array<i32>} : memref<5x64xf32, #tpu.memory_space<vmem>>, vector<5x64xf32>,
    %c1_i32 = arith.constant 1 : i32
    %9 = arith.cmpi eq, %arg1, %c1_i32 : i32
    %10 = arith.extui %9 : i1 to i32
    %c0_i32_8 = arith.constant 0 : i32
    %11 = arith.cmpi ne, %10, %c0_i32_8 : i32
    scf.if %11 {
      %c0_9 = arith.constant 0 : index
      %c0_10 = arith.constant 0 : index
      %12 = vector.load %arg12[%c0_9, %c0_10] : memref<5x64xf32, #tpu.memory_space<vmem>>, vector<5x64xf32>
      %13 = vector.extract_strided_slice %12 {offsets = [0, 0], sizes = [5, 32], strides = [1, 1]} : vector<5x64xf32> to vector<5x32xf32>
      %14 = vector.extract_strided_slice %12 {offsets = [0, 32], sizes = [5, 32], strides = [1, 1]} : vector<5x64xf32> to vector<5x32xf32>
      %15 = tpu.concatenate %13, %14 in 0 : vector<5x32xf32>, vector<5x32xf32> -> vector<10x32xf32>
      %c0_11 = arith.constant 0 : index
      %c0_12 = arith.constant 0 : index
      %16 = vector.load %arg4[%c0_11, %c0_12] : memref<32x64xf32, #tpu.memory_space<vmem>>, vector<32x64xf32>
      %cst_13 = arith.constant dense<0.000000e+00> : vector<10x64xf32>
      %17 = tpu.matmul %15, %16, %cst_13 {dimension_numbers = #tpu.dot_dimension_numbers<[1], [0], [0], [1], [0, 0, 1, 1], [], []>} : vector<10x32xf32>, vector<32x64xf32>, vector<10x64xf32> -> vector<10x64xf32>
      %c0_14 = arith.constant 0 : index
      %c0_15 = arith.constant 0 : index
      %18 = vector.load %arg5[%c0_14, %c0_15] : memref<1x64xf32, #tpu.memory_space<vmem>>, vector<1x64xf32>
      %19 = vector.broadcast %18 : vector<1x64xf32> to vector<10x64xf32>
      %20 = arith.addf %17, %19 : vector<10x64xf32>
      %cst_16 = arith.constant 0.000000e+00 : f32
      %21 = vector.broadcast %cst_16 : f32 to vector<10x64xf32>
      %22 = arith.maximumf %20, %21 : vector<10x64xf32>
      %c0_17 = arith.constant 0 : index
      %c0_18 = arith.constant 0 : index
      %23 = vector.load %arg6[%c0_17, %c0_18] : memref<5x64xf32, #tpu.memory_space<vmem>>, vector<5x64xf32>
      %c0_19 = arith.constant 0 : index
      %c0_20 = arith.constant 0 : index
      %24 = vector.load %arg8[%c0_19, %c0_20] : memref<5x32xf32, #tpu.memory_space<vmem>>, vector<5x32xf32>
      %25 = tpu.concatenate %23, %23 in 0 : vector<5x64xf32>, vector<5x64xf32> -> vector<10x64xf32>
      %26 = tpu.concatenate %24, %24 in 0 : vector<5x32xf32>, vector<5x32xf32> -> vector<10x32xf32>
      %27 = arith.mulf %22, %25 : vector<10x64xf32>
      %c0_21 = arith.constant 0 : index
      %c0_22 = arith.constant 0 : index
      %28 = vector.load %arg7[%c0_21, %c0_22] : memref<64x32xf32, #tpu.memory_space<vmem>>, vector<64x32xf32>
      %cst_23 = arith.constant dense<0.000000e+00> : vector<10x32xf32>
      %29 = tpu.matmul %27, %28, %cst_23 {dimension_numbers = #tpu.dot_dimension_numbers<[1], [0], [0], [1], [0, 0, 1, 1], [], []>} : vector<10x64xf32>, vector<64x32xf32>, vector<10x32xf32> -> vector<10x32xf32>
      %30 = arith.addf %29, %26 : vector<10x32xf32>
      %cst_24 = arith.constant dense<0.000000e+00> : vector<10xf32>
      %31 = vector.multi_reduction <add>, %30, %cst_24 [1] : vector<10x32xf32> to vector<10xf32>
      %32 = vector.shape_cast %31 : vector<10xf32> to vector<10x1xf32>
      %cst_25 = arith.constant 3.200000e+01 : f32
      %33 = vector.broadcast %cst_25 : f32 to vector<10x1xf32>
      %34 = arith.divf %32, %33 : vector<10x1xf32>
      %35 = vector.broadcast %34 : vector<10x1xf32> to vector<10x32xf32>
      %36 = arith.subf %30, %35 : vector<10x32xf32>
      %37 = arith.mulf %36, %36 : vector<10x32xf32>
      %cst_26 = arith.constant dense<0.000000e+00> : vector<10xf32>
      %38 = vector.multi_reduction <add>, %37, %cst_26 [1] : vector<10x32xf32> to vector<10xf32>
      %39 = vector.shape_cast %38 : vector<10xf32> to vector<10x1xf32>
      %cst_27 = arith.constant 3.200000e+01 : f32
      %40 = vector.broadcast %cst_27 : f32 to vector<10x1xf32>
      %41 = arith.divf %39, %40 : vector<10x1xf32>
      %42 = vector.broadcast %34 : vector<10x1xf32> to vector<10x32xf32>
      %43 = arith.subf %30, %42 : vector<10x32xf32>
      %cst_28 = arith.constant 9.99999974E-6 : f32
      %44 = vector.broadcast %cst_28 : f32 to vector<10x1xf32>
      %45 = arith.addf %41, %44 : vector<10x1xf32>
      %46 = math.rsqrt %45 : vector<10x1xf32>
      %47 = vector.broadcast %46 : vector<10x1xf32> to vector<10x32xf32>
      %48 = arith.mulf %43, %47 : vector<10x32xf32>
      %c0_29 = arith.constant 0 : index
      %c0_30 = arith.constant 0 : index
      %49 = vector.load %arg9[%c0_29, %c0_30] : memref<1x32xf32, #tpu.memory_space<vmem>>, vector<1x32xf32>
      %50 = vector.broadcast %49 : vector<1x32xf32> to vector<10x32xf32>
      %51 = arith.mulf %48, %50 : vector<10x32xf32>
      %c0_31 = arith.constant 0 : index
      %c0_32 = arith.constant 0 : index
      %52 = vector.load %arg10[%c0_31, %c0_32] : memref<1x32xf32, #tpu.memory_space<vmem>>, vector<1x32xf32>
      %53 = vector.broadcast %52 : vector<1x32xf32> to vector<10x32xf32>
      %54 = arith.addf %51, %53 : vector<10x32xf32>
      %c0_33 = arith.constant 0 : index
      %c0_34 = arith.constant 0 : index
      %55 = vector.load %arg11[%c0_33, %c0_34] : memref<10x32xf32, #tpu.memory_space<vmem>>, vector<10x32xf32>
      tpu.vector_store %arg11[%c0_33, %c0_34], %54 {strides = array<i32>} : memref<10x32xf32, #tpu.memory_space<vmem>>, vector<10x32xf32>,
    } else {
    }
    return
  }
  func.func @transform_0(%arg0: i32, %arg1: i32) -> (i32, i32) {
    %c0_i32 = arith.constant 0 : i32
    return %arg0, %arg1 : i32, i32
  }
  func.func @transform_1(%arg0: i32, %arg1: i32) -> (i32, i32) {
    %c0_i32 = arith.constant 0 : i32
    %c0_i32_0 = arith.constant 0 : i32
    return %c0_i32, %arg1 : i32, i32
  }
  func.func @transform_2(%arg0: i32, %arg1: i32) -> (i32, i32) {
    %c0_i32 = arith.constant 0 : i32
    %c0_i32_0 = arith.constant 0 : i32
    %c0_i32_1 = arith.constant 0 : i32
    return %c0_i32, %c0_i32_0 : i32, i32
  }
  func.func @transform_3(%arg0: i32, %arg1: i32) -> (i32, i32) {
    %c0_i32 = arith.constant 0 : i32
    %c0_i32_0 = arith.constant 0 : i32
    %c0_i32_1 = arith.constant 0 : i32
    return %c0_i32, %c0_i32_0 : i32, i32
  }
  func.func @transform_4(%arg0: i32, %arg1: i32) -> (i32, i32) {
    %c0_i32 = arith.constant 0 : i32
    %c0_i32_0 = arith.constant 0 : i32
    %c0_i32_1 = arith.constant 0 : i32
    return %c0_i32, %c0_i32_0 : i32, i32
  }
  func.func @transform_5(%arg0: i32, %arg1: i32) -> (i32, i32) {
    %c0_i32 = arith.constant 0 : i32
    %c0_i32_0 = arith.constant 0 : i32
    %c0_i32_1 = arith.constant 0 : i32
    return %c0_i32, %c0_i32_0 : i32, i32
  }
  func.func @transform_6(%arg0: i32, %arg1: i32) -> (i32, i32) {
    %c0_i32 = arith.constant 0 : i32
    %c0_i32_0 = arith.constant 0 : i32
    %c0_i32_1 = arith.constant 0 : i32
    return %c0_i32, %c0_i32_0 : i32, i32
  }
  func.func @transform_7(%arg0: i32, %arg1: i32) -> (i32, i32) {
    %c0_i32 = arith.constant 0 : i32
    %c0_i32_0 = arith.constant 0 : i32
    %c0_i32_1 = arith.constant 0 : i32
    return %c0_i32, %c0_i32_0 : i32, i32
  }
  func.func @transform_8(%arg0: i32, %arg1: i32) -> (i32, i32) {
    %c0_i32 = arith.constant 0 : i32
    %c0_i32_0 = arith.constant 0 : i32
    %c0_i32_1 = arith.constant 0 : i32
    return %c0_i32, %c0_i32_0 : i32, i32
  }
  func.func @transform_9(%arg0: i32, %arg1: i32) -> (i32, i32) {
    %c0_i32 = arith.constant 0 : i32
    %c0_i32_0 = arith.constant 0 : i32
    return %arg0, %c0_i32 : i32, i32
  }
}

</mosaic_0001>

<bundles_post_ra>
// kernel: tpu_custom_call.1
= control target key start
LH: loop header
LB: loop body
LE: loop exit
PB: predicated region body
PF: predicated region fallthrough
CT: control target
= control target key end

     0   :  { %14 = vsyncpa [#allocation4], 0  ;;  %s1425_s0 = inlined_call_operand.hbm [shape: f32[64,256], index: 0, kind: input, shape index: {}]   ;;  %s1426_s1 = inlined_call_operand.vmem [shape: f32[5,256], index: 1, kind: input, shape index: {}]   ;;  %s1427_s2 = inlined_call_operand.vmem [shape: f32[32,64], index: 2, kind: input, shape index: {}]   ;;  %s1428_s3 = inlined_call_operand.vmem [shape: f32[1,64], index: 3, kind: input, shape index: {}]   ;;  %s1429_s4 = inlined_call_operand.vmem [shape: f32[5,64], index: 4, kind: input, shape index: {}]   ;;  %s1430_s5 = inlined_call_operand.vmem [shape: f32[64,32], index: 5, kind: input, shape index: {}]   ;;  %s1431_s6 = inlined_call_operand.vmem [shape: f32[5,32], index: 6, kind: input, shape index: {}]   ;;  %s1432_s7 = inlined_call_operand.vmem [shape: f32[1,32], index: 7, kind: input, shape index: {}]   ;;  %s1433_s8 = inlined_call_operand.vmem [shape: f32[1,32], index: 8, kind: input, shape index: {}]   ;;  %s1434_s9 = inlined_call_operand.hbm [shape: f32[10,32], index: 9, kind: output, shape index: {}]  }
   0x1   :  { %16 = vsyncpa [#allocation4 + $0x1], 0 }
   0x2   :  { %17 = vsyncpa [#allocation5], 0  ;;  %s1192_s30 = smov 0   ;;  %s1194_s10 = smov 0  }
   0x3   :  { %s1196_s11 = smov 0   ;;  %s1198_s12 = smov 0  }
   0x4   :  { %s1200_s13 = smov 0   ;;  %s1202_s14 = smov 0  }
   0x5 LB: > { %s811_s15 = sadd.s32 4294967295, %s1128_s14   ;;  %s32_s16 = sadd.s32 1, %s1124_s13  ;;  %s1128_s14 = sphi %s1202_s14, %s23_s14   ;;  %s1124_s13 = sphi %s1200_s13, %s1444_s13   ;;  %s1120_s12 = sphi %s1198_s12, %s1443_s12   ;;  %s1116_s11 = sphi %s1196_s11, %s1442_s11   ;;  %s1112_s10 = sphi %s1194_s10, %s1441_s10   ;;  %s1108_s30 = sphi %s1192_s30, %s1440_s30  }
   0x6   : > { %p33_p0 = scmp.ge.s32.totalorder %s32_s16, 2  ;;  %s44_s17 = sadd.s32 1, %s1116_s11 }
   0x7   : > { %p51_p1 = scmp.ne.s32.totalorder %s1116_s11, %s1112_s10  ;;  %p52_p2 = scmp.eq.s32.totalorder %s1128_s14, 0 }
   0x8   : > { %s1446_s16 = smov (%p33_p0, %s32_s16), 0  ;;  %p57_p4 = scmp.ne.s32.totalorder %s1112_s10, %s1108_s30 }
   0x9   : > { %p1228_p3 = por %p52_p2, %p51_p1  ;;  %s40_s19 = ssub.s32 %s1124_s13, %s1446_s16 }
   0xa   : > { %p58_p5 = scmp.eq.s32.totalorder %s811_s15, 0  ;;  %p42_p6 = scmp.eq.s32.totalorder %s40_s19, 0 }
   0xb   : > { %p952_p8 = scmp.lt.s32.totalorder %s1128_s14, 2  ;;  %s301_s22 = sand.u32 1, %s1116_s11  }
   0xc   : > { %p1237_p7 = por %p58_p5, %p57_p4  ;;  %s815_s23 = sshll.u32 %s1124_s13, 7 }
   0xd   : > { %s1243_s21 = scalar_select %p42_p6, %s1116_s11, %s44_s17  }
   0xe   : > { %s814_s24 = sshll.u32 %s301_s22, 6  ;;  %s1250_s27 = scalar_lea.hbm %s1425_s0, %s815_s23 }
   0xf   : > { %s305_s28 = scalar_lea.vmem [#allocation3], %s814_s24  ;;  %p1254_p9 = pnand %p952_p8, %p1228_p3 }
  0x10   : > { %s314_s29 = sshll.u32 %s305_s28, 4  ;;  %s1261_s17 = scalar_lea.sflag [#allocation4], %s301_s22  ;;  %s1258_s29 = int_to_ptr.vmem [resolvable:$true] %s314_s29 }
  0x11   : > { %s1018_s19 = scalar_lea.hbm %s1250_s27, 1024  ;;  %p1020_p12 = pneg %p1254_p9 }
  0x12   : > { %p1019_p11 = scmp.ne.s32.totalorder %s1250_s27, %s1018_s19  ;;  %s1023_s24 = scalar_lea.hbm %s1425_s0, 2048 }
  0x13   : > { %p1024_p1 = scmp.lt.u32.totalorder %s1250_s27, %s1425_s0  ;;  %p1025_p2 = scmp.lt.u32.totalorder %s1023_s24, %s1018_s19 }
  0x14   : > { %p1021_p13 = pnand %p1020_p12, %p1019_p11  ;;  %p1027_p4 = scmp.lt.u32.totalorder %s1018_s19, %s1250_s27 }
  0x15   : > { %p1026_p3 = por %p1025_p2, %p1024_p1 }
  0x16   : > { %p1022_p0 = pneg %p1021_p13 }
  0x17   : > { %p1028_p5 = por %p1027_p4, %p1026_p3 }
  0x19   : > { %p1029_p6 = pnand %p1028_p5, %p1022_p0 }
  0x1b   : > { %1032 = shalt.err (!%p1029_p6)
}
  0x1c   : > { %s1033_s22 = scalar_lea.vmem %s1258_s29, 1024  ;;  %s1130_s28 = smov [#allocation3]  }
  0x1d   : > { %p1034_p8 = scmp.ne.s32.totalorder %s1258_s29, %s1033_s22  ;;  %s1038_s18 = sshll.u32 %s1130_s28, 4  ;;  %s1039_s18 = int_to_ptr.vmem [resolvable:$false] %s1038_s18 }
  0x1e   : > { %s1040_s23 = scalar_lea.vmem %s1039_s18, 2048  ;;  %p1041_p10 = scmp.lt.s32.totalorder %s1258_s29, %s1039_s18 }
  0x1f   : > { %p1036_p11 = pnand %p1034_p8, %p1020_p12  ;;  %p1042_p1 = scmp.lt.s32.totalorder %s1040_s23, %s1033_s22 }
  0x21   : > { %p1037_p13 = pneg %p1036_p11  ;;  %p1043_p2 = por %p1042_p1, %p1041_p10 }
  0x23   : > { %p1044_p3 = pnand %p1043_p2, %p1037_p13 }
  0x25   : > { %1047 = shalt.err (!%p1044_p3)
}
  0x26   : > { %s1131_s19 = smov 256   ;;  %s1132_s24 = smov 128  }
  0x27   : > { %s1133_s25 = smov 8   ;;  %p329_p12 = scmp.lt.s32.totalorder %s1128_s14, 3 }
  0x28   : > { %951 = dma.hbm_to_vmem [thread:$0]  (!%p1254_p9), %s1250_s27, 1024, %s1258_s29, %s1261_s17, %s1131_s19, %s1132_s24, %s1133_s25  }
  0x29   : > { %p1438_p0 = scmp.ge.s32.totalorder %s1128_s14, 1 }
  0x2b   : > { %p330_p4 = pnand %p1438_p0, %p329_p12 }
  0x2c   : > { %s335_s26 = sand.u32 (!%p330_p4), 1, %s1112_s10  }
  0x2d   : > { %333 = sbr.rel (%p330_p4) target bundleno = 1217 (0x4c1), region = 56  ;;  %s817_s22 = sshll.u32 (!%p330_p4), %s335_s26, 6 }
  0x2e   : > { %s336_s28 = scalar_lea.sflag (!%p330_p4), [#allocation4], %s335_s26  ;;  %s1293_s18 = scalar_lea.vmem (!%p330_p4), [#allocation3], %s817_s22 }
  0x34   : > { %1099 = dma.done.wait (%p1237_p7), %s336_s28, 1024  }
  0x35   : > { %1101 = vsyncadd (%p1237_p7), %s336_s28, 4294966272  ;;  %p374_p10 = scmp.lt.s32.totalorder %s1120_s12, 1  ;;  %p819_p9 = scmp.ne.s32.totalorder %s1120_s12, 0 }
  0x36   : > { %vm383_vm0 = vcmask (!%p819_p9), 520192   ;;  %v1134_v0 = vmov (!%p819_p9), 0.0  }
  0x37   : > { %s375_s27 = scalar_select %p374_p10, %s1120_s12, 1 }
  0x38   : > { %382 = sbr.rel (%p819_p9) target bundleno = 63 (0x3f), region = 64  ;;  %384 = vst.msk [vmem:[#allocation2] sm:$0x1f] (!%p819_p9), %vm383_vm0, %v1134_v0 }
  0x39   : > { %s818_s29 = sshll.u32 %s375_s27, 3 }
  0x3a   : > { %s1304_s23 = scalar_lea.vmem %s1426_s1, %s818_s29 }
  0x3f PF: > { %v385_v1 = vld [vmem:[%s1293_s18] sm:$0xff]  ;;  %v386_v2 = vld [vmem:[%s1293_s18 + $0x8] sm:$0xff]  ;;  %v1135_v3 = vmov 0.0|0.0   ;;  %vm1136_vm1 = vmmov 0   ;;  %v1137_v5 = vmov 0.0   ;;  %v387_v6 = vld [vmem:[%s1293_s18 + $0x10] sm:$0xff] }
  0x40   : > { %906 = vmatprep.subr.bf16.mxu0 %v1135_v3  ;;  %v907_v4 = vpack.c.bf16 %v386_v2, %v385_v1  ;;  %873 = vmatprep.mubr.msk.f32.mxu0 %vm1136_vm1, %v1137_v5  ;;  %v388_v7 = vld [vmem:[%s1293_s18 + $0x18] sm:$0xff]  ;;  %v389_v9 = vld [vmem:[%s1293_s18 + $0x20] sm:$0xff]  ;;  %v390_v10 = vld [vmem:[%s1293_s18 + $0x28] sm:$0xff]  ;;  %vm466_vm2 = vcmask 520192   ;;  %p820_p7 = scmp.ne.s32.totalorder %s1120_s12, 1 }
  0x41   : > { %v910_v8 = vpack.c.bf16 %v388_v7, %v387_v6  ;;  %v913_v11 = vpack.c.bf16 %v390_v10, %v389_v9  ;;  %v391_v12 = vld [vmem:[%s1293_s18 + $0x30] sm:$0xff]  ;;  %v392_v13 = vld [vmem:[%s1293_s18 + $0x38] sm:$0xff]  ;;  %v481_v22 = vld [vmem:[%s1427_s2 + $0x8] sm:$0xff] (!%p820_p7)  ;;  %s1138_s24 = smov (!%p820_p7), 96   ;;  %vm478_vm3 = vcmask (!%p820_p7), 1044480   ;;  %vm491_vm4 = vcmask (!%p820_p7), 261120  }
  0x42   : > { %908 = vmatpush3.bf16.xpose.msra.mxu0 %v907_v4  ;;  %v916_v14 = vpack.c.bf16 %v392_v13, %v391_v12  ;;  %v394_v15 = vld [vmem:[%s1304_s23] sm:$0x1f]  ;;  %v482_v25 = vld [vmem:[%s1427_s2 + $0x10] sm:$0xff] (!%p820_p7)  ;;  %v483_v26 = vld [vmem:[%s1427_s2 + $0x18] sm:$0xff] (!%p820_p7)  ;;  %vm594_vm5 = vcmask (!%p820_p7), 523264   ;;  %vm679_vm6 = vcmask (!%p820_p7), 254976  }
  0x43   : > { %909 = vmatprep.subr.bf16.mxu0 %v1135_v3  ;;  %v393_v16 = vld [vmem:[#allocation2] sm:$0x1f]  ;;  %v922_v28 = vpack.c.bf16 (!%p820_p7), %v483_v26, %v482_v25  ;;  %v587_v29 = vld [vmem:[%s1430_s5 + $0x8] sm:$0xff] (!%p820_p7)  ;;  %v588_v30 = vld [vmem:[%s1430_s5 + $0x10] sm:$0xff] (!%p820_p7) }
  0x44   : > { %v480_v21 = vld [vmem:[%s1427_s2] sm:$0xff] (!%p820_p7)  ;;  %v589_v31 = vld [vmem:[%s1430_s5 + $0x18] sm:$0xff] (!%p820_p7)  ;;  %v591_v37 = vld [vmem:[%s1430_s5 + $0x28] sm:$0xff] (!%p820_p7) }
  0x45   : > { %v918_v24 = vpack.c.bf16 (!%p820_p7), %v481_v22, %v480_v21  ;;  %v586_v27 = vld [vmem:[%s1430_s5] sm:$0xff] (!%p820_p7)  ;;  %v930_v33 = vpack.c.bf16 (!%p820_p7), %v589_v31, %v588_v30  ;;  %v592_v39 = vld [vmem:[%s1430_s5 + $0x30] sm:$0xff] (!%p820_p7)  ;;  %v593_v40 = vld [vmem:[%s1430_s5 + $0x38] sm:$0xff] (!%p820_p7) }
  0x46   : > { %v926_v32 = vpack.c.bf16 (!%p820_p7), %v587_v29, %v586_v27  ;;  %v590_v36 = vld [vmem:[%s1430_s5 + $0x20] sm:$0xff] (!%p820_p7)  ;;  %v938_v41 = vpack.c.bf16 (!%p820_p7), %v593_v40, %v592_v39 }
  0x47   : > { %v934_v38 = vpack.c.bf16 (!%p820_p7), %v591_v37, %v590_v36  ;;  %v574_v42 = vld [vmem:[%s1429_s4] sm:$0x1f] (!%p820_p7) }
  0x48   : > { %927 = vmatprep.subr.bf16.mxu1 (!%p820_p7), %v926_v32  ;;  %v821_v43 = vld [vmem:[%s1428_s3] ss:$0 sm:$0xff] (!%p820_p7)  ;;  %v577_v44 = vrot.slane (!%p820_p7), %v574_v42, 3 }
  0x49   : > { %929 = vmatpush3.bf16.msra.mxu1 (!%p820_p7), %v926_v32  ;;  %v575_v54 = vld [vmem:[%s1431_s6] sm:$0x1f] (!%p820_p7) }
  0x4a   : > { %911 = vmatpush3.bf16.xpose.msra.mxu0 %v910_v8  ;;  %931 = vmatprep.subr.bf16.mxu1 (!%p820_p7), %v930_v33  ;;  %v579_v50 = vsel (!%p820_p7), %vm478_vm3, %v574_v42, %v577_v44  ;;  %v581_v55 = vrot.slane (!%p820_p7), %v575_v54, 3 }
  0x4b   : > { %912 = vmatprep.subr.bf16.mxu0 %v1135_v3 }
  0x4c   : > { %v583_v56 = vsel (!%p820_p7), %vm478_vm3, %v575_v54, %v581_v55 }
  0x4d   : > { %933 = vmatpush3.bf16.msra.mxu1 (!%p820_p7), %v930_v33 }
  0x4e   : > { %935 = vmatprep.subr.bf16.mxu1 (!%p820_p7), %v934_v38 }
  0x51   : > { %937 = vmatpush3.bf16.msra.mxu1 (!%p820_p7), %v934_v38 }
  0x52   : > { %914 = vmatpush3.bf16.xpose.msra.mxu0 %v913_v11  ;;  %939 = vmatprep.subr.bf16.mxu1 (!%p820_p7), %v938_v41 }
  0x53   : > { %915 = vmatprep.subr.bf16.mxu0 %v1135_v3 }
  0x55   : > { %941 = vmatpush3.bf16.msra.mxu1 (!%p820_p7), %v938_v41 }
  0x5a   : > { %917 = vmatpush3.bf16.xpose.msra.mxu0 %v916_v14 }
  0x5b   : > { %919 = vmatprep.subr.bf16.mxu0 (!%p820_p7), %v918_v24 }
  0x61   : > { %874 = vmatmul.mubr.f32.vlgmr.msra.gmra.mrb[0].mxu0 %v394_v15 }
  0x62   : > { %921 = vmatpush3.bf16.msra.mxu0 (!%p820_p7), %v918_v24 }
  0x63   : > { %923 = vmatprep.subr.bf16.mxu0 (!%p820_p7), %v922_v28 }
  0x66   : > { %925 = vmatpush3.bf16.msra.mxu0 (!%p820_p7), %v922_v28 }
 0x131   : > { %471 = sbr.rel (%p820_p7) target bundleno = 1191 (0x4a7), region = 68 }
 0x134   : > { %v461_v17 = vpop.f32.mrb[0].mxu0 }
 0x135   : > { %v465_v18 = vadd.f32 %v461_v17, %v393_v16  ;;  %v875_v19 = vpop.f32.mrb[1].mxu0  ;;  %v826_v16 = vld [vmem:[%s1432_s7] ss:$0 sm:$0xff] (!%p820_p7) }
 0x137   : > { %467 = vst.msk [vmem:[#allocation2] sm:$0x1f] %vm466_vm2, %v465_v18  ;;  %v827_v18 = vld [vmem:[%s1433_s8] ss:$0 sm:$0xff] (!%p820_p7) }
 0x13e   : > { %v472_v20 = vld [vmem:[#allocation2] sm:$0x1f] }
 0x13f   : > { %v474_v23 = vrot.slane %v472_v20, 3 }
 0x141   : > { %475 = vrot.lane.b32.xlu0 %v474_v23, %s1138_s24 }
 0x1b3   : > { %v476_v34 = vpop.permute.xlu0 %475 }
 0x1b4   : > { %v479_v35 = vsel %vm478_vm3, %v472_v20, %v476_v34 }
 0x1b5   : > { %884 = vmatprep.mubr.msk.f32.mxu0 %vm491_vm4, %v479_v35 }
 0x1b6   : > { %885 = vmatmul.mubr.msk.f32.vlgmr.msra.gmra.mrb[0].mxu0 %vm491_vm4, %v476_v34 }
 0x289   : > { %v886_v45 = vpop.f32.mrb[0].mxu0 }
 0x28a   : > { %v569_v46 = vadd.f32 %v886_v45, %v821_v43  ;;  %v563_v47 = vpop.f32.mrb[1].mxu0 }
 0x28b   : > { %v564_v48 = vadd.f32 %v821_v43, %v563_v47 }
 0x28c   : > { %v573_v49 = vmax.f32 %v569_v46, 0.0 }
 0x28d   : > { %v572_v51 = vmax.f32 %v564_v48, 0.0 }
 0x28e   : > { %v585_v53 = vmul.f32 %v577_v44, %v573_v49 }
 0x28f   : > { %v584_v52 = vmul.f32 %v579_v50, %v572_v51 }
 0x291   : > { %903 = vmatprep.mubr.msk.f32.mxu1 %vm594_vm5, %v584_v52 }
 0x292   : > { %904 = vmatmul.mubr.msk.f32.vlgmr.msra.gmra.mrb[0].mxu1 %vm594_vm5, %v585_v53 }
 0x365   : > { %v905_v57 = vpop.f32.mrb[0].mxu1 }
 0x366   : > { %v673_v58 = vadd.f32 %v905_v57, %v581_v55  ;;  %v667_v59 = vpop.f32.mrb[1].mxu1 }
 0x367   : > { %v668_v60 = vadd.f32 %v667_v59, %v583_v56 }
 0x368   : > { %v680_v61 = vsel %vm679_vm6, %v673_v58, 0.0 }
 0x369   : > { %681 = vadd.xlane.f32.xlu1 %v680_v61  ;;  %v676_v62 = vsel %vm491_vm4, %v668_v60, 0.0 }
 0x36a   : > { %677 = vadd.xlane.f32.xlu0 %v676_v62 }
 0x3f6   : > { %v682_v63 = vpop.xlane.xlu1 %681 }
 0x3f7   : > { %v685_v0 = vmul.f32 0.03125, %v682_v63  ;;  %v678_v1 = vpop.xlane.xlu0 %677 }
 0x3f8   : > { %v684_v2 = vmul.f32 0.03125, %v678_v1 }
 0x3f9   : > { %v687_v3 = vsub.f32 %v673_v58, %v685_v0 }
 0x3fa   : > { %v686_v4 = vsub.f32 %v668_v60, %v684_v2 }
 0x3fb   : > { %v689_v7 = vmul.f32 %v687_v3, %v687_v3 }
 0x3fc   : > { %v688_v5 = vmul.f32 %v686_v4, %v686_v4 }
 0x3fd   : > { %v693_v8 = vsel %vm679_vm6, %v689_v7, 0.0 }
 0x3fe   : > { %v690_v6 = vsel %vm491_vm4, %v688_v5, 0.0 }
 0x3ff   : > { %691 = vadd.xlane.f32.xlu1 %v690_v6 }
 0x403   : > { %694 = vadd.xlane.f32.xlu1 %v693_v8 }
 0x48c   : > { %v692_v9 = vpop.xlane.xlu1 %691 }
 0x48d   : > { %v696_v10 = vmul.f32 0.03125, %v692_v9 }
 0x48f   : > { %v698_v11 = vadd.f32 1e-05, %v696_v10 }
 0x490   : > { %v695_v12 = vpop.xlane.xlu1 %694 }
 0x491   : > { %1014 = vrsqrt.f32 %v698_v11  ;;  %v697_v13 = vmul.f32 0.03125, %v695_v12 }
 0x493   : > { %v699_v14 = vadd.f32 1e-05, %v697_v13 }
 0x495   : > { %1016 = vrsqrt.f32 %v699_v14 }
 0x49b   : > { %v1015_v15 = vpop.eup %1014 }
 0x49c   : > { %v702_v17 = vmul.f32 %v1015_v15, %v686_v4 }
 0x49e   : > { %v711_v19 = vmul.f32 %v826_v16, %v702_v17 }
 0x49f   : > { %v1017_v20 = vpop.eup %1016 }
 0x4a0   : > { %v720_v21 = vadd.f32 %v827_v18, %v711_v19  ;;  %v703_v22 = vmul.f32 %v1017_v20, %v687_v3 }
 0x4a2   : > { %722 = vst.msk [vmem:[#allocation6] sm:$0xff] %vm491_vm4, %v720_v21  ;;  %v712_v23 = vmul.f32 %v826_v16, %v703_v22 }
 0x4a4   : > { %v721_v24 = vadd.f32 %v827_v18, %v712_v23 }
 0x4a6   : > { %723 = vst.msk [vmem:[#allocation6 + $0x8] sm:$0x3] %vm679_vm6, %v721_v24 }
 0x4a7 PF: > { %p1381_p5 = scmp.eq.s32.totalorder %s811_s15, 1  ;;  %s1139_s12 = smov [#allocation6]  }
 0x4a8   : > { %s733_s27 = sshll.u32 %s1139_s12, 4  ;;  %s734_s27 = int_to_ptr.vmem [resolvable:$true] %s733_s27 }
 0x4a9   : > { %s1048_s29 = scalar_lea.vmem %s734_s27, 256  ;;  %p1055_p13 = scmp.lt.s32.totalorder %s734_s27, %s734_s27 }
 0x4aa   : > { %p1049_p6 = scmp.ne.s32.totalorder %s734_s27, %s1048_s29  ;;  %p1056_p1 = scmp.lt.s32.totalorder %s1048_s29, %s1048_s29 }
 0x4ac   : > { %p1050_p8 = pnand %p1049_p6, %p1381_p5  ;;  %p1057_p2 = por %p1056_p1, %p1055_p13 }
 0x4ae   : > { %p1051_p11 = pneg %p1050_p8 }
 0x4b0   : > { %p1058_p3 = pnand %p1057_p2, %p1051_p11 }
 0x4b2   : > { %1061 = shalt.err (!%p1058_p3)
}
 0x4b3   : > { %s1062_s15 = scalar_lea.hbm %s1434_s9, 256 }
 0x4b4   : > { %p1063_p12 = scmp.ne.s32.totalorder %s1434_s9, %s1062_s15  ;;  %p1068_p10 = scmp.lt.u32.totalorder %s1062_s15, %s1434_s9 }
 0x4b6   : > { %p1064_p0 = pnand %p1063_p12, %p1381_p5 }
 0x4b8   : > { %p1065_p4 = pneg %p1064_p0 }
 0x4ba   : > { %p1070_p9 = pnand %p1068_p10, %p1065_p4 }
 0x4bc   : > { %1073 = shalt.err (!%p1070_p9)
}
 0x4bd   : > { %s1140_s25 = smov 128   ;;  %s1141_s26 = smov 8  }
 0x4be   : > { %945 = dma.vmem_to_hbm [thread:$0]  (%p1381_p5), %s734_s27, 256, %s1434_s9, [#allocation5], %s1140_s25, %s1140_s25, %s1141_s26  }
 0x4bf   : > { %1103 = dma.done.wait (%p1381_p5), [#allocation5], 256  }
 0x4c0   : > { %1105 = vsyncadd (%p1381_p5), [#allocation5], 4294967040 }
 0x4c1 PF: > { %s23_s14 = sadd.s32 1, %s1128_s14   ;;  %s1440_s30 = smov %s1112_s10 }
 0x4c2   : > { %p20_p7 = scmp.ge.s32.totalorder %s23_s14, 4   ;;  %s1441_s10 = smov %s1116_s11 }
 0x4c3   : > { %s1442_s11 = smov %s1243_s21  ;;  %s1443_s12 = smov %s1124_s13 }
 0x4c4   : > { %s1444_s13 = smov %s1446_s16  ;;  %22 = sbr.rel (!%p20_p7) target bundleno = 5 (0x5), region = 105 }
 0x4cb   :  { %749 = vsyncpa [#allocation4], 1 }
 0x4cc   :  { %751 = vsyncpa [#allocation4 + $0x1], 1 }
 0x4cd   :  { %752 = vsyncpa [#allocation5], 1 }
 0x4ce   :  { %754 = vsyncpa [#allocation5 + $0x1], 1 }

</bundles_post_ra>
